<compile_context>
chip_gen: v5e
topology: v5e:2x2
jax: 0.10.0
libtpu: 0.0.40
codegen_flags: <defaults>
</compile_context>

<pallas_src>
import jax
import jax.numpy as jnp
import numpy as np
from jax.experimental import pallas as pl
from jax.experimental.pallas import tpu as pltpu


def _round_up(n, m):
    return (n + m - 1) // m * m


# ----------------------------- fused Pallas kernel -----------------------------

def _fused_forward_kernel(x_ref, w1_ref, b1_ref, w2_ref, b2_ref,
                          wl1_ref, bl1_ref, wl2_ref, bl2_ref, o_ref):
    # conv1 (1->8, 3x3, SAME) as a dense (64 -> 512) bf16 matmul, f32 acc.
    # Output columns ordered (dy, dx, ph, pw, c_out): four 128-lane slabs.
    h1 = jnp.dot(x_ref[...], w1_ref[...],
                 preferred_element_type=jnp.float32)            # (Bt, 512) f32

    # 2x2/stride-2 maxpool == elementwise max of the four (dy, dx) slabs.
    # Bias-add + ReLU are commuted through the max (exact: bias is identical
    # across slabs, relu monotonic) so they run on 128 lanes instead of 512.
    p = jnp.maximum(jnp.maximum(h1[:, 0:128], h1[:, 128:256]),
                    jnp.maximum(h1[:, 256:384], h1[:, 384:512]))
    p = jnp.maximum(p + b1_ref[...], 0.0)                       # (Bt, 128) f32

    # conv2 (8->16, 3x3, SAME) as a dense (128 -> 256) bf16 matmul.
    # Output columns already in torch NCHW view(B,-1) order.
    h2 = jnp.dot(p.astype(jnp.bfloat16), w2_ref[...],
                 preferred_element_type=jnp.float32)
    h2 = jnp.maximum(h2 + b2_ref[...], 0.0)                     # (Bt, 256) f32

    # linear1 (256->64) + ReLU
    z = jnp.dot(h2.astype(jnp.bfloat16), wl1_ref[...],
                preferred_element_type=jnp.float32)
    z = jnp.maximum(z + bl1_ref[...], 0.0)                      # (Bt, 64) f32

    # linear2 (64->3), zero-padded to 8 output lanes (full last dim of output).
    out = jnp.dot(z.astype(jnp.bfloat16), wl2_ref[...],
                  preferred_element_type=jnp.float32)
    o_ref[...] = out + bl2_ref[...]                             # (Bt, 8) f32


# --------------------- init-time weight layout preparation ---------------------

def _conv1_dense(w1):
    """conv1 (O=8,I=1,3,3) -> dense (64, 512).

    Row    = input pixel ih*8 + iw.
    Column = dy*256 + dx*128 + ph*32 + pw*8 + c_out   (h = 2*ph+dy, w = 2*pw+dx).
    """
    cols = np.arange(512)
    c = cols % 8
    pw = (cols // 8) % 4
    ph = (cols // 32) % 4
    dx = (cols // 128) % 2
    dy = (cols // 256) % 2
    h = 2 * ph + dy
    w = 2 * pw + dx
    rows = np.arange(64)
    ih = rows // 8
    iw = rows % 8
    kh = ih[:, None] - h[None, :] + 1                    # (64, 512)
    kw = iw[:, None] - w[None, :] + 1
    valid = (kh >= 0) & (kh < 3) & (kw >= 0) & (kw < 3)
    khc = np.clip(kh, 0, 2)
    kwc = np.clip(kw, 0, 2)
    co = np.broadcast_to(c[None, :], (64, 512))
    gathered = w1[co, 0, khc, kwc]                       # jnp gather, (64, 512)
    return jnp.where(jnp.asarray(valid), gathered, 0.0).astype(jnp.float32)


def _conv2_dense(w2):
    """conv2 (O=16,I=8,3,3) -> dense (128, 256).

    Row    = pooled NHWC index ph*32 + pw*8 + c_in.
    Column = torch NCHW flatten index c_out*16 + h*4 + w.
    """
    rows = np.arange(128)
    cin = rows % 8
    pw_i = (rows // 8) % 4
    ph_i = rows // 32
    cols = np.arange(256)
    w_o = cols % 4
    h_o = (cols // 4) % 4
    cout = cols // 16
    kh = ph_i[:, None] - h_o[None, :] + 1                # (128, 256)
    kw = pw_i[:, None] - w_o[None, :] + 1
    valid = (kh >= 0) & (kh < 3) & (kw >= 0) & (kw < 3)
    khc = np.clip(kh, 0, 2)
    kwc = np.clip(kw, 0, 2)
    co = np.broadcast_to(cout[None, :], (128, 256))
    ci = np.broadcast_to(cin[:, None], (128, 256))
    gathered = w2[co, ci, khc, kwc]
    return jnp.where(jnp.asarray(valid), gathered, 0.0).astype(jnp.float32)


def prepare_params(params):
    """One-time weight relayout: conv->dense bf16 matrices, transposes, f32 biases."""
    w1f = _conv1_dense(params["w1"]).astype(jnp.bfloat16)              # (64, 512)
    # conv1 bias folded to one 128-lane slab (ph, pw, c order) -- applied after pool.
    b1f = jnp.tile(params["b1"].astype(jnp.float32), 16).reshape(1, 128)
    w2f = _conv2_dense(params["w2"]).astype(jnp.bfloat16)              # (128, 256)
    b2f = jnp.repeat(params["b2"].astype(jnp.float32), 16).reshape(1, 256)
    wl1t = params["wl1"].T.astype(jnp.bfloat16)                        # (256, 64)
    bl1 = params["bl1"].astype(jnp.float32).reshape(1, 64)
    wl2t = jnp.zeros((64, 8), jnp.float32).at[:, :3].set(
        params["wl2"].T).astype(jnp.bfloat16)                          # (64, 8)
    bl2 = jnp.zeros((1, 8), jnp.float32).at[:, :3].set(params["bl2"])
    return dict(w1f=w1f, b1f=b1f, w2f=w2f, b2f=b2f,
                wl1t=wl1t, bl1=bl1, wl2t=wl2t, bl2=bl2)


# --------------------------------- forward ---------------------------------

def forward(x, prepped, *, block_b=2048):
    """x: (B, 64) float -> logits (B, 3). Single fused Pallas call."""
    B = x.shape[0]
    Bp8 = _round_up(B, 8)
    # Batch tile: large to amortize per-step pipeline overhead, but guarantee
    # >= 2 grid steps so the "parallel" axis can shard across v7x's 2 TCs.
    Bt = min(block_b, max(8, _round_up((Bp8 + 1) // 2, 8)))
    Bp = _round_up(Bp8, Bt)
    if Bp // Bt < 2:
        Bp = 2 * Bt
    xp = x.astype(jnp.bfloat16)
    if Bp != B:
        xp = jnp.pad(xp, ((0, Bp - B), (0, 0)))

    def full(shape):
        return pl.BlockSpec(shape, lambda i: (0, 0))    # VMEM-resident across grid

    flops = Bp * 2 * (64 * 512 + 128 * 256 + 256 * 64 + 64 * 8)
    weight_bytes = (64 * 512 + 128 * 256 + 256 * 64 + 64 * 8) * 2 \
                 + (128 + 256 + 64 + 8) * 4
    bytes_accessed = Bp * 64 * 2 + Bp * 8 * 4 + weight_bytes

    out = pl.pallas_call(
        _fused_forward_kernel,
        out_shape=jax.ShapeDtypeStruct((Bp, 8), jnp.float32),
        grid=(Bp // Bt,),
        in_specs=[
            pl.BlockSpec((Bt, 64), lambda i: (i, 0)),   # x, batch-tiled (bf16)
            full((64, 512)), full((1, 128)),            # conv1 dense + pooled bias
            full((128, 256)), full((1, 256)),           # conv2 dense + bias
            full((256, 64)), full((1, 64)),             # linear1 (pre-transposed)
            full((64, 8)), full((1, 8)),                # linear2 (8-lane padded)
        ],
        out_specs=pl.BlockSpec((Bt, 8), lambda i: (i, 0)),
        compiler_params=pltpu.CompilerParams(
            dimension_semantics=("parallel",),
            vmem_limit_bytes=32 * 1024 * 1024),
        cost_estimate=pl.CostEstimate(
            flops=flops, transcendentals=0, bytes_accessed=bytes_accessed),
    )(xp, prepped["w1f"], prepped["b1f"], prepped["w2f"], prepped["b2f"],
      prepped["wl1t"], prepped["bl1"], prepped["wl2t"], prepped["bl2"])
    return out[:B, :3]


# ------------------------------ reference (JAX) ------------------------------

def init_params(key):
    """Deterministic synthetic parameters with the module's shapes."""
    ks = jax.random.split(key, 8)
    return {
        "w1": jax.random.normal(ks[0], (8, 1, 3, 3), jnp.float32) * 0.2,
        "b1": jax.random.normal(ks[1], (8,), jnp.float32) * 0.1,
        "w2": jax.random.normal(ks[2], (16, 8, 3, 3), jnp.float32) * 0.1,
        "b2": jax.random.normal(ks[3], (16,), jnp.float32) * 0.1,
        "wl1": jax.random.normal(ks[4], (64, 256), jnp.float32) * 0.05,  # torch (out,in)
        "bl1": jax.random.normal(ks[5], (64,), jnp.float32) * 0.1,
        "wl2": jax.random.normal(ks[6], (3, 64), jnp.float32) * 0.1,
        "bl2": jax.random.normal(ks[7], (3,), jnp.float32) * 0.1,
    }


def reference(x, p):
    """Pure-JAX fp32 reference mirroring the (intended) PyTorch forward in NCHW."""
    B = x.shape[0]
    xi = x.reshape(B, 1, 8, 8)
    y = jax.lax.conv_general_dilated(
        xi, p["w1"], (1, 1), "SAME",
        dimension_numbers=("NCHW", "OIHW", "NCHW")) + p["b1"][None, :, None, None]
    y = jnp.maximum(y, 0.0)
    y = jax.lax.reduce_window(y, -jnp.inf, jax.lax.max,
                              (1, 1, 2, 2), (1, 1, 2, 2), "VALID")
    y = jax.lax.conv_general_dilated(
        y, p["w2"], (1, 1), "SAME",
        dimension_numbers=("NCHW", "OIHW", "NCHW")) + p["b2"][None, :, None, None]
    y = jnp.maximum(y, 0.0)
    y = y.reshape(B, -1)
    y = jnp.maximum(y @ p["wl1"].T + p["bl1"], 0.0)
    y = y @ p["wl2"].T + p["bl2"]
    return y


if __name__ == "__main__":
    batch_size = 2
    x = jax.random.normal(jax.random.PRNGKey(0), (batch_size, 64), jnp.float32)
    params = init_params(jax.random.PRNGKey(42))

    prepped = prepare_params(params)                 # one-time weight relayout
    fwd = jax.jit(lambda xx: forward(xx, prepped))

    out = jax.block_until_ready(fwd(x))
    ref = jax.block_until_ready(reference(x, params))

    assert out.shape == (batch_size, 3), out.shape
    # bf16 matmul operands (f32 accumulation) vs fp32 reference -> relaxed tol.
    np.testing.assert_allclose(np.asarray(out), np.asarray(ref),
                               rtol=3e-2, atol=3e-2)
    print("KERNEL_OK")
</pallas_src>

<mosaic_0001>
module attributes {stable_mosaic.version = 11 : i64} {
  func.func @_fused_forward_kernel(%arg0: i32, %arg1: memref<8x64xbf16, #tpu.memory_space<vmem>>, %arg2: memref<64x512xbf16, #tpu.memory_space<vmem>>, %arg3: memref<1x128xf32, #tpu.memory_space<vmem>>, %arg4: memref<128x256xbf16, #tpu.memory_space<vmem>>, %arg5: memref<1x256xf32, #tpu.memory_space<vmem>>, %arg6: memref<256x64xbf16, #tpu.memory_space<vmem>>, %arg7: memref<1x64xf32, #tpu.memory_space<vmem>>, %arg8: memref<64x8xbf16, #tpu.memory_space<vmem>>, %arg9: memref<1x8xf32, #tpu.memory_space<vmem>>, %arg10: memref<8x8xf32, #tpu.memory_space<vmem>>) attributes {dimension_semantics = [#tpu.dimension_semantics<parallel>], iteration_bounds = array<i64: 2>, scalar_prefetch = 0 : i64, scratch_operands = 0 : i64, tpu.core_type = #tpu.core_type<tc>, window_params = [{transform_indices = @transform_0, window_bounds = array<i64: 8, 64>}, {pipeline_mode = #tpu.pipeline_mode<synchronous>, transform_indices = @transform_1, window_bounds = array<i64: 64, 512>}, {pipeline_mode = #tpu.pipeline_mode<synchronous>, transform_indices = @transform_2, window_bounds = array<i64: 1, 128>}, {pipeline_mode = #tpu.pipeline_mode<synchronous>, transform_indices = @transform_3, window_bounds = array<i64: 128, 256>}, {pipeline_mode = #tpu.pipeline_mode<synchronous>, transform_indices = @transform_4, window_bounds = array<i64: 1, 256>}, {pipeline_mode = #tpu.pipeline_mode<synchronous>, transform_indices = @transform_5, window_bounds = array<i64: 256, 64>}, {pipeline_mode = #tpu.pipeline_mode<synchronous>, transform_indices = @transform_6, window_bounds = array<i64: 1, 64>}, {pipeline_mode = #tpu.pipeline_mode<synchronous>, transform_indices = @transform_7, window_bounds = array<i64: 64, 8>}, {pipeline_mode = #tpu.pipeline_mode<synchronous>, transform_indices = @transform_8, window_bounds = array<i64: 1, 8>}, {transform_indices = @transform_9, window_bounds = array<i64: 8, 8>}]} {
    %c0 = arith.constant 0 : index
    %c0_0 = arith.constant 0 : index
    %0 = vector.load %arg1[%c0, %c0_0] : memref<8x64xbf16, #tpu.memory_space<vmem>>, vector<8x64xbf16>
    %c0_1 = arith.constant 0 : index
    %c0_2 = arith.constant 0 : index
    %1 = vector.load %arg2[%c0_1, %c0_2] : memref<64x512xbf16, #tpu.memory_space<vmem>>, vector<64x512xbf16>
    %cst = arith.constant dense<0.000000e+00> : vector<8x512xf32>
    %2 = tpu.matmul %0, %1, %cst {dimension_numbers = #tpu.dot_dimension_numbers<[1], [0], [0], [1], [0, 0, 1, 1], [], []>} : vector<8x64xbf16>, vector<64x512xbf16>, vector<8x512xf32> -> vector<8x512xf32>
    %3 = vector.extract_strided_slice %2 {offsets = [0, 0], sizes = [8, 128], strides = [1, 1]} : vector<8x512xf32> to vector<8x128xf32>
    %4 = vector.extract_strided_slice %2 {offsets = [0, 128], sizes = [8, 128], strides = [1, 1]} : vector<8x512xf32> to vector<8x128xf32>
    %5 = arith.maximumf %3, %4 : vector<8x128xf32>
    %6 = vector.extract_strided_slice %2 {offsets = [0, 256], sizes = [8, 128], strides = [1, 1]} : vector<8x512xf32> to vector<8x128xf32>
    %7 = vector.extract_strided_slice %2 {offsets = [0, 384], sizes = [8, 128], strides = [1, 1]} : vector<8x512xf32> to vector<8x128xf32>
    %8 = arith.maximumf %6, %7 : vector<8x128xf32>
    %9 = arith.maximumf %5, %8 : vector<8x128xf32>
    %c0_3 = arith.constant 0 : index
    %c0_4 = arith.constant 0 : index
    %10 = vector.load %arg3[%c0_3, %c0_4] : memref<1x128xf32, #tpu.memory_space<vmem>>, vector<1x128xf32>
    %11 = vector.broadcast %10 : vector<1x128xf32> to vector<8x128xf32>
    %12 = arith.addf %9, %11 : vector<8x128xf32>
    %cst_5 = arith.constant 0.000000e+00 : f32
    %13 = vector.broadcast %cst_5 : f32 to vector<8x128xf32>
    %14 = arith.maximumf %12, %13 : vector<8x128xf32>
    %15 = arith.truncf %14 : vector<8x128xf32> to vector<8x128xbf16>
    %c0_6 = arith.constant 0 : index
    %c0_7 = arith.constant 0 : index
    %16 = vector.load %arg4[%c0_6, %c0_7] : memref<128x256xbf16, #tpu.memory_space<vmem>>, vector<128x256xbf16>
    %cst_8 = arith.constant dense<0.000000e+00> : vector<8x256xf32>
    %17 = tpu.matmul %15, %16, %cst_8 {dimension_numbers = #tpu.dot_dimension_numbers<[1], [0], [0], [1], [0, 0, 1, 1], [], []>} : vector<8x128xbf16>, vector<128x256xbf16>, vector<8x256xf32> -> vector<8x256xf32>
    %c0_9 = arith.constant 0 : index
    %c0_10 = arith.constant 0 : index
    %18 = vector.load %arg5[%c0_9, %c0_10] : memref<1x256xf32, #tpu.memory_space<vmem>>, vector<1x256xf32>
    %19 = vector.broadcast %18 : vector<1x256xf32> to vector<8x256xf32>
    %20 = arith.addf %17, %19 : vector<8x256xf32>
    %cst_11 = arith.constant 0.000000e+00 : f32
    %21 = vector.broadcast %cst_11 : f32 to vector<8x256xf32>
    %22 = arith.maximumf %20, %21 : vector<8x256xf32>
    %23 = arith.truncf %22 : vector<8x256xf32> to vector<8x256xbf16>
    %c0_12 = arith.constant 0 : index
    %c0_13 = arith.constant 0 : index
    %24 = vector.load %arg6[%c0_12, %c0_13] : memref<256x64xbf16, #tpu.memory_space<vmem>>, vector<256x64xbf16>
    %cst_14 = arith.constant dense<0.000000e+00> : vector<8x64xf32>
    %25 = tpu.matmul %23, %24, %cst_14 {dimension_numbers = #tpu.dot_dimension_numbers<[1], [0], [0], [1], [0, 0, 1, 1], [], []>} : vector<8x256xbf16>, vector<256x64xbf16>, vector<8x64xf32> -> vector<8x64xf32>
    %c0_15 = arith.constant 0 : index
    %c0_16 = arith.constant 0 : index
    %26 = vector.load %arg7[%c0_15, %c0_16] : memref<1x64xf32, #tpu.memory_space<vmem>>, vector<1x64xf32>
    %27 = vector.broadcast %26 : vector<1x64xf32> to vector<8x64xf32>
    %28 = arith.addf %25, %27 : vector<8x64xf32>
    %cst_17 = arith.constant 0.000000e+00 : f32
    %29 = vector.broadcast %cst_17 : f32 to vector<8x64xf32>
    %30 = arith.maximumf %28, %29 : vector<8x64xf32>
    %31 = arith.truncf %30 : vector<8x64xf32> to vector<8x64xbf16>
    %c0_18 = arith.constant 0 : index
    %c0_19 = arith.constant 0 : index
    %32 = vector.load %arg8[%c0_18, %c0_19] : memref<64x8xbf16, #tpu.memory_space<vmem>>, vector<64x8xbf16>
    %cst_20 = arith.constant dense<0.000000e+00> : vector<8x8xf32>
    %33 = tpu.matmul %31, %32, %cst_20 {dimension_numbers = #tpu.dot_dimension_numbers<[1], [0], [0], [1], [0, 0, 1, 1], [], []>} : vector<8x64xbf16>, vector<64x8xbf16>, vector<8x8xf32> -> vector<8x8xf32>
    %c0_21 = arith.constant 0 : index
    %c0_22 = arith.constant 0 : index
    %34 = vector.load %arg9[%c0_21, %c0_22] : memref<1x8xf32, #tpu.memory_space<vmem>>, vector<1x8xf32>
    %35 = vector.broadcast %34 : vector<1x8xf32> to vector<8x8xf32>
    %36 = arith.addf %33, %35 : vector<8x8xf32>
    %c0_23 = arith.constant 0 : index
    %c0_24 = arith.constant 0 : index
    %37 = vector.load %arg10[%c0_23, %c0_24] : memref<8x8xf32, #tpu.memory_space<vmem>>, vector<8x8xf32>
    tpu.vector_store %arg10[%c0_23, %c0_24], %36 {strides = array<i32>} : memref<8x8xf32, #tpu.memory_space<vmem>>, vector<8x8xf32>,
    return
  }
  func.func @transform_0(%arg0: i32) -> (i32, i32) {
    %c0_i32 = arith.constant 0 : i32
    %c0_i32_0 = arith.constant 0 : i32
    return %arg0, %c0_i32 : i32, i32
  }
  func.func @transform_1(%arg0: i32) -> (i32, i32) {
    %c0_i32 = arith.constant 0 : i32
    %c0_i32_0 = arith.constant 0 : i32
    %c0_i32_1 = arith.constant 0 : i32
    return %c0_i32, %c0_i32_0 : i32, i32
  }
  func.func @transform_2(%arg0: i32) -> (i32, i32) {
    %c0_i32 = arith.constant 0 : i32
    %c0_i32_0 = arith.constant 0 : i32
    %c0_i32_1 = arith.constant 0 : i32
    return %c0_i32, %c0_i32_0 : i32, i32
  }
  func.func @transform_3(%arg0: i32) -> (i32, i32) {
    %c0_i32 = arith.constant 0 : i32
    %c0_i32_0 = arith.constant 0 : i32
    %c0_i32_1 = arith.constant 0 : i32
    return %c0_i32, %c0_i32_0 : i32, i32
  }
  func.func @transform_4(%arg0: i32) -> (i32, i32) {
    %c0_i32 = arith.constant 0 : i32
    %c0_i32_0 = arith.constant 0 : i32
    %c0_i32_1 = arith.constant 0 : i32
    return %c0_i32, %c0_i32_0 : i32, i32
  }
  func.func @transform_5(%arg0: i32) -> (i32, i32) {
    %c0_i32 = arith.constant 0 : i32
    %c0_i32_0 = arith.constant 0 : i32
    %c0_i32_1 = arith.constant 0 : i32
    return %c0_i32, %c0_i32_0 : i32, i32
  }
  func.func @transform_6(%arg0: i32) -> (i32, i32) {
    %c0_i32 = arith.constant 0 : i32
    %c0_i32_0 = arith.constant 0 : i32
    %c0_i32_1 = arith.constant 0 : i32
    return %c0_i32, %c0_i32_0 : i32, i32
  }
  func.func @transform_7(%arg0: i32) -> (i32, i32) {
    %c0_i32 = arith.constant 0 : i32
    %c0_i32_0 = arith.constant 0 : i32
    %c0_i32_1 = arith.constant 0 : i32
    return %c0_i32, %c0_i32_0 : i32, i32
  }
  func.func @transform_8(%arg0: i32) -> (i32, i32) {
    %c0_i32 = arith.constant 0 : i32
    %c0_i32_0 = arith.constant 0 : i32
    %c0_i32_1 = arith.constant 0 : i32
    return %c0_i32, %c0_i32_0 : i32, i32
  }
  func.func @transform_9(%arg0: i32) -> (i32, i32) {
    %c0_i32 = arith.constant 0 : i32
    %c0_i32_0 = arith.constant 0 : i32
    return %arg0, %c0_i32 : i32, i32
  }
}

</mosaic_0001>

<bundles_post_ra>
// kernel: _lambda_.1
= control target key start
LH: loop header
LB: loop body
LE: loop exit
PB: predicated region body
PF: predicated region fallthrough
CT: control target
= control target key end

     0   :  { %14 = vsyncpa [#allocation3], 0  ;;  %s1630_s0 = inlined_call_operand.vmem [shape: bf16[16,64], index: 0, kind: input, shape index: {}]   ;;  %s1631_s1 = inlined_call_operand.hbm [shape: bf16[64,512], index: 1, kind: input, shape index: {}]   ;;  %s1632_s2 = inlined_call_operand.vmem [shape: f32[1,128], index: 2, kind: input, shape index: {}]   ;;  %s1633_s3 = inlined_call_operand.hbm [shape: bf16[128,256], index: 3, kind: input, shape index: {}]   ;;  %s1634_s4 = inlined_call_operand.vmem [shape: f32[1,256], index: 4, kind: input, shape index: {}]   ;;  %s1635_s5 = inlined_call_operand.hbm [shape: bf16[256,64], index: 5, kind: input, shape index: {}]   ;;  %s1636_s6 = inlined_call_operand.vmem [shape: f32[1,64], index: 6, kind: input, shape index: {}]   ;;  %s1637_s7 = inlined_call_operand.hbm [shape: bf16[64,8], index: 7, kind: input, shape index: {}]   ;;  %s1638_s8 = inlined_call_operand.vmem [shape: f32[1,8], index: 8, kind: input, shape index: {}]   ;;  %s1639_s9 = inlined_call_operand.vmem [shape: f32[16,8], index: 9, kind: output, shape index: {}]  }
   0x1   :  { %15 = vsyncpa [#allocation5], 0 }
   0x2   :  { %16 = vsyncpa [#allocation8], 0  ;;  %s1539_s30 = smov 0  }
   0x3 LB: > { %s275_s12 = sshll.u32 %s1633_s3, 4  ;;  %s1548_s13 = sadd.s32 4294967295, %s1477_s30   ;;  %s1477_s30 = sphi %s1539_s30, %s22_s30   ;;  %s276_s12 = int_to_ptr.hbm [resolvable:$true] %s275_s12 }
   0x4   : > { %p1001_p0 = scmp.ge.s32.totalorder %s1477_s30, 1  ;;  %p247_p1 = scmp.lt.s32.totalorder %s1477_s30, 3 }
   0x5   : > { %p1310_p2 = scmp.eq.s32.totalorder %s1548_s13, 0  ;;  %s1479_s15 = smov [#allocation4]  }
   0x6   : > { %p1553_p3 = pnand %p1001_p0, %p247_p1  ;;  %s277_s16 = sshll.u32 %s1479_s15, 4  ;;  %s278_s16 = int_to_ptr.vmem [resolvable:$true] %s277_s16 }
   0x7   : > { %s258_s19 = sshll.u32 %s1631_s1, 4  ;;  %s1480_s21 = smov [#allocation2]   ;;  %s259_s19 = int_to_ptr.hbm [resolvable:$true] %s258_s19 }
   0x8   : > { %p1297_p4 = pneg %p1553_p3  ;;  %s260_s22 = sshll.u32 %s1480_s21, 4  ;;  %s261_s22 = int_to_ptr.vmem [resolvable:$true] %s260_s22 }
   0x9   : > { %s1481_s23 = smov 128   ;;  %s1482_s24 = smov 8  }
   0xa   : > { %p1564_p5 = pnand %p1310_p2, %p1297_p4  ;;  %s292_s27 = sshll.u32 %s1635_s5, 4  ;;  %s293_s27 = int_to_ptr.hbm [resolvable:$true] %s292_s27 }
   0xb   : > { %s1483_s28 = smov 256   ;;  %s1484_s29 = smov 16  }
   0xc   : > { %1303 = dma.hbm_to_vmem [thread:$0]  (!%p1564_p5), %s276_s12, 2048, %s278_s16, [#allocation5], %s1481_s23, %s1481_s23, %s1482_s24  }
   0xd   : > { %1300 = dma.hbm_to_vmem [thread:$0]  (!%p1564_p5), %s259_s19, 2048, %s261_s22, [#allocation3], %s1483_s28, %s1483_s28, %s1484_s29  }
   0xe   : > { %s1485_s10 = smov [#allocation6]   ;;  %s1486_s15 = smov 64  }
   0xf   : > { %s294_s11 = sshll.u32 %s1485_s10, 4  ;;  %s1487_s17 = smov 4   ;;  %s295_s11 = int_to_ptr.vmem [resolvable:$true] %s294_s11 }
  0x10   : > { %1306 = dma.hbm_to_vmem [thread:$0]  (!%p1564_p5), %s293_s27, 2048, %s295_s11, [#allocation5], %s1486_s15, %s1486_s15, %s1487_s17  }
  0x11   : > { %s309_s12 = sshll.u32 %s1637_s7, 4  ;;  %s1488_s16 = smov [#allocation7]   ;;  %s310_s12 = int_to_ptr.hbm [resolvable:$true] %s309_s12 }
  0x12   : > { %s311_s23 = sshll.u32 %s1488_s16, 4  ;;  %337 = sbr.rel (%p1553_p3) target bundleno = 597 (0x255), region = 56  ;;  %s312_s23 = int_to_ptr.vmem [resolvable:$true] %s311_s23 }
  0x13   : > { %1309 = dma.hbm_to_vmem [thread:$0]  (!%p1564_p5), %s310_s12, 512, %s312_s23, [#allocation8], %s1486_s15, %s1486_s15, %s1487_s17  }
  0x17   : > { %1464 = dma.done.wait (%p1310_p2), [#allocation3], 2048  }
  0x18   : > { %1466 = vsyncadd (%p1310_p2), [#allocation3], 4294965248 }
  0x19   : > { %1468 = dma.done.wait (%p1310_p2), [#allocation5], 4096  }
  0x1a   : > { %1470 = vsyncadd (%p1310_p2), [#allocation5], 4294963200 }
  0x1b   : > { %1472 = dma.done.wait (%p1310_p2), [#allocation8], 512  }
  0x1c   : > { %1474 = vsyncadd (%p1310_p2), [#allocation8], 4294966784  ;;  %p387_p6 = scmp.lt.s32.totalorder %s1548_s13, 1  ;;  %v1064_v0 = vld [vmem:[#allocation2 + $0x60] sm:$0xf]  ;;  %vm493_vm0 = vcmask 523264  }
  0x1d   : > { %v1243_v1 = vld [vmem:[#allocation2 + $0x6c] sm:$0xf0]  ;;  %v1241_v2 = vld [vmem:[#allocation2 + $0x64] sm:$0xf]  ;;  %v1066_v4 = vld [vmem:[#allocation2 + $0x70] sm:$0xf0] }
  0x1e   : > { %s1643_s13 = smov (!%p387_p6, %s1548_s13), 1  ;;  %v1065_v3 = vor.u32 %v1243_v1, %v1064_v0  ;;  %v1072_v5 = vld [vmem:[#allocation2 + $0x68] sm:$0xf]  ;;  %v1244_v6 = vld [vmem:[#allocation2 + $0x74] sm:$0xf0]  ;;  %v1069_v7 = vor.u32 %v1241_v2, %v1066_v4  ;;  %vm903_vm1 = vcmask 64512  }
  0x1f   : > { %s1012_s14 = sshll.u32 %s1643_s13, 2  ;;  %v1073_v8 = vor.u32 %v1244_v6, %v1072_v5  ;;  %v1242_v9 = vld [vmem:[#allocation2 + $0x6c] sm:$0xf]  ;;  %v1074_v10 = vld [vmem:[#allocation2 + $0x78] sm:$0xf0]  ;;  %s1013_s10 = sshll.u32 %s1643_s13, 3 }
  0x20   : > { %v1048_v11 = vld [vmem:[#allocation2 + $0x40] sm:$0xf]  ;;  %501 = vmatpush.bf16.msra.mxu0 %v1065_v3  ;;  %v1077_v12 = vor.u32 %v1242_v9, %v1074_v10  ;;  %v1239_v13 = vld [vmem:[#allocation2 + $0x4c] sm:$0xf0]  ;;  %v1237_v14 = vld [vmem:[#allocation2 + $0x44] sm:$0xf]  ;;  %514 = vmatpush.bf16.msra.mxu1 %v1069_v7  ;;  %s390_s22 = scalar_lea.vmem %s1630_s0, %s1012_s14  ;;  %s394_s21 = scalar_lea.vmem %s1639_s9, %s1013_s10 }
  0x21   : > { %v1050_v15 = vld [vmem:[#allocation2 + $0x50] sm:$0xf0]  ;;  %527 = vmatpush.bf16.msra.mxu2 %v1073_v8  ;;  %v1049_v16 = vor.u32 %v1239_v13, %v1048_v11  ;;  %v1056_v18 = vld [vmem:[#allocation2 + $0x48] sm:$0xf]  ;;  %v1240_v19 = vld [vmem:[#allocation2 + $0x54] sm:$0xf0] }
  0x22   : > { %v1053_v17 = vor.u32 %v1237_v14, %v1050_v15  ;;  %v1238_v20 = vld [vmem:[#allocation2 + $0x4c] sm:$0xf]  ;;  %540 = vmatpush.bf16.msra.mxu3 %v1077_v12  ;;  %v1057_v21 = vor.u32 %v1240_v19, %v1056_v18  ;;  %v1058_v22 = vld [vmem:[#allocation2 + $0x58] sm:$0xf0]  ;;  %v1032_v23 = vld [vmem:[#allocation2 + $0x20] sm:$0xf] }
  0x23   : > { %v1235_v24 = vld [vmem:[#allocation2 + $0x2c] sm:$0xf0]  ;;  %v1061_v25 = vor.u32 %v1238_v20, %v1058_v22  ;;  %v1233_v26 = vld [vmem:[#allocation2 + $0x24] sm:$0xf]  ;;  %v1034_v27 = vld [vmem:[#allocation2 + $0x30] sm:$0xf0] }
  0x24   : > { %v1040_v28 = vld [vmem:[#allocation2 + $0x28] sm:$0xf]  ;;  %502 = vmatpush.bf16.msra.mxu0 %v1049_v16  ;;  %v1033_v29 = vor.u32 %v1235_v24, %v1032_v23  ;;  %v1236_v30 = vld [vmem:[#allocation2 + $0x34] sm:$0xf0]  ;;  %v1234_v31 = vld [vmem:[#allocation2 + $0x2c] sm:$0xf]  ;;  %515 = vmatpush.bf16.msra.mxu1 %v1053_v17  ;;  %v1037_v33 = vor.u32 %v1233_v26, %v1034_v27 }
  0x25   : > { %v1042_v32 = vld [vmem:[#allocation2 + $0x38] sm:$0xf0]  ;;  %528 = vmatpush.bf16.msra.mxu2 %v1057_v21  ;;  %v1041_v34 = vor.u32 %v1236_v30, %v1040_v28  ;;  %v1016_v35 = vld [vmem:[#allocation2] sm:$0xf]  ;;  %v1231_v36 = vld [vmem:[#allocation2 + $0xc] sm:$0xf0] }
  0x26   : > { %v1229_v37 = vld [vmem:[#allocation2 + $0x4] sm:$0xf]  ;;  %541 = vmatpush.bf16.msra.mxu3 %v1061_v25  ;;  %v1045_v38 = vor.u32 %v1234_v31, %v1042_v32  ;;  %v1018_v39 = vld [vmem:[#allocation2 + $0x10] sm:$0xf0]  ;;  %v1024_v40 = vld [vmem:[#allocation2 + $0x8] sm:$0xf]  ;;  %v1017_v44 = vor.u32 %v1231_v36, %v1016_v35 }
  0x27   : > { %v1232_v41 = vld [vmem:[#allocation2 + $0x14] sm:$0xf0]  ;;  %v1230_v42 = vld [vmem:[#allocation2 + $0xc] sm:$0xf]  ;;  %v1026_v43 = vld [vmem:[#allocation2 + $0x18] sm:$0xf0]  ;;  %v1021_v48 = vor.u32 %v1229_v37, %v1018_v39 }
  0x28   : > { %503 = vmatpush.bf16.msra.mxu0 %v1033_v29  ;;  %v1140_v45 = vld [vmem:[#allocation4 + $0x70] sm:$0xf]  ;;  %v1260_v46 = vld [vmem:[#allocation4 + $0x74] sm:$0xf0]  ;;  %v1259_v47 = vld [vmem:[#allocation4 + $0x74] sm:$0xf]  ;;  %516 = vmatpush.bf16.msra.mxu1 %v1037_v33  ;;  %v1025_v49 = vor.u32 %v1232_v41, %v1024_v40  ;;  %v1029_v51 = vor.u32 %v1230_v42, %v1026_v43 }
  0x29   : > { %529 = vmatpush.bf16.msra.mxu2 %v1041_v34  ;;  %v1142_v50 = vld [vmem:[#allocation4 + $0x78] sm:$0xf0]  ;;  %v1141_v52 = vor.u32 %v1260_v46, %v1140_v45  ;;  %v1132_v54 = vld [vmem:[#allocation4 + $0x60] sm:$0xf]  ;;  %v1258_v55 = vld [vmem:[#allocation4 + $0x64] sm:$0xf0] }
  0x2a   : > { %542 = vmatpush.bf16.msra.mxu3 %v1045_v38  ;;  %v1145_v53 = vor.u32 %v1259_v47, %v1142_v50  ;;  %v396_v56 = vld [vmem:[%s390_s22] sm:$0xf]  ;;  %v1257_v57 = vld [vmem:[#allocation4 + $0x64] sm:$0xf]  ;;  %v1134_v58 = vld [vmem:[#allocation4 + $0x68] sm:$0xf0]  ;;  %v1133_v59 = vor.u32 %v1258_v55, %v1132_v54 }
  0x2b   : > { %v1137_v60 = vor.u32 %v1257_v57, %v1134_v58  ;;  %v1124_v61 = vld [vmem:[#allocation4 + $0x50] sm:$0xf]  ;;  %v1256_v62 = vld [vmem:[#allocation4 + $0x54] sm:$0xf0]  ;;  %v1255_v63 = vld [vmem:[#allocation4 + $0x54] sm:$0xf] }
  0x2c   : > { %504 = vmatpush.bf16.msra.mxu0 %v1017_v44  ;;  %517 = vmatpush.bf16.msra.mxu1 %v1021_v48  ;;  %v1126_v0 = vld [vmem:[#allocation4 + $0x58] sm:$0xf0]  ;;  %v1125_v1 = vor.u32 %v1256_v62, %v1124_v61  ;;  %v1116_v3 = vld [vmem:[#allocation4 + $0x40] sm:$0xf]  ;;  %v1254_v4 = vld [vmem:[#allocation4 + $0x44] sm:$0xf0] }
  0x2d   : > { %530 = vmatpush.bf16.msra.mxu2 %v1025_v49  ;;  %v1129_v2 = vor.u32 %v1255_v63, %v1126_v0  ;;  %v1253_v5 = vld [vmem:[#allocation4 + $0x44] sm:$0xf]  ;;  %v1118_v6 = vld [vmem:[#allocation4 + $0x48] sm:$0xf0]  ;;  %v1117_v7 = vor.u32 %v1254_v4, %v1116_v3  ;;  %v1108_v9 = vld [vmem:[#allocation4 + $0x30] sm:$0xf] }
  0x2e   : > { %543 = vmatpush.bf16.msra.mxu3 %v1029_v51  ;;  %v1121_v8 = vor.u32 %v1253_v5, %v1118_v6  ;;  %v1252_v10 = vld [vmem:[#allocation4 + $0x34] sm:$0xf0]  ;;  %v1251_v11 = vld [vmem:[#allocation4 + $0x34] sm:$0xf]  ;;  %v1110_v13 = vld [vmem:[#allocation4 + $0x38] sm:$0xf0] }
  0x2f   : > { %1078 = vmatmul.msk.bf16.vlgmr.msra.gmra.mxu0 %vm493_vm0, %v396_v56  ;;  %1079 = vmatmul.msk.bf16.vlgmr.msra.gmra.mxu1 %vm493_vm0, %v396_v56  ;;  %v1109_v12 = vor.u32 %v1252_v10, %v1108_v9  ;;  %v1113_v14 = vor.u32 %v1251_v11, %v1110_v13  ;;  %v1100_v15 = vld [vmem:[#allocation4 + $0x20] sm:$0xf]  ;;  %v1250_v16 = vld [vmem:[#allocation4 + $0x24] sm:$0xf0]  ;;  %v1249_v17 = vld [vmem:[#allocation4 + $0x24] sm:$0xf] }
  0x30   : > { %661 = vmatpush.bf16.msrb.mxu0 %v1141_v52  ;;  %674 = vmatpush.bf16.msrb.mxu1 %v1145_v53  ;;  %v1101_v18 = vor.u32 %v1250_v16, %v1100_v15  ;;  %v1102_v19 = vld [vmem:[#allocation4 + $0x28] sm:$0xf0]  ;;  %v1092_v21 = vld [vmem:[#allocation4 + $0x10] sm:$0xf]  ;;  %v1248_v22 = vld [vmem:[#allocation4 + $0x14] sm:$0xf0] }
  0x31   : > { %1080 = vmatmul.msk.bf16.vlgmr.msra.gmra.mxu2 %vm493_vm0, %v396_v56  ;;  %1081 = vmatmul.msk.bf16.vlgmr.msra.gmra.mxu3 %vm493_vm0, %v396_v56  ;;  %v1105_v20 = vor.u32 %v1249_v17, %v1102_v19  ;;  %v1247_v23 = vld [vmem:[#allocation4 + $0x14] sm:$0xf]  ;;  %v1093_v24 = vor.u32 %v1248_v22, %v1092_v21  ;;  %v1094_v25 = vld [vmem:[#allocation4 + $0x18] sm:$0xf0]  ;;  %v1084_v27 = vld [vmem:[#allocation4] sm:$0xf] }
  0x32   : > { %v1097_v26 = vor.u32 %v1247_v23, %v1094_v25  ;;  %v1246_v28 = vld [vmem:[#allocation4 + $0x4] sm:$0xf0]  ;;  %v1245_v29 = vld [vmem:[#allocation4 + $0x4] sm:$0xf]  ;;  %v1086_v31 = vld [vmem:[#allocation4 + $0x8] sm:$0xf0] }
  0x33   : > { %v1085_v30 = vor.u32 %v1246_v28, %v1084_v27  ;;  %v1089_v32 = vor.u32 %v1245_v29, %v1086_v31  ;;  %v1268_v33 = vld [vmem:[#allocation6 + $0x38] sm:$0xff]  ;;  %v1267_v35 = vld [vmem:[#allocation6 + $0x30] sm:$0xff]  ;;  %v1266_v37 = vld [vmem:[#allocation6 + $0x28] sm:$0xff] }
  0x34   : > { %662 = vmatpush.bf16.msrb.mxu0 %v1133_v59  ;;  %675 = vmatpush.bf16.msrb.mxu1 %v1137_v60  ;;  %v1276_v34 = vld [vmem:[#allocation6 + $0x78] sm:$0xff]  ;;  %v1275_v36 = vld [vmem:[#allocation6 + $0x70] sm:$0xff]  ;;  %v1274_v38 = vld [vmem:[#allocation6 + $0x68] sm:$0xff] }
  0x35   : > { %823 = vmatpush.bf16.msrb.mxu2 %v1268_v33  ;;  %836 = vmatpush.bf16.msrb.mxu3 %v1276_v34  ;;  %v1265_v39 = vld [vmem:[#allocation6 + $0x20] sm:$0xff]  ;;  %v1264_v43 = vld [vmem:[#allocation6 + $0x18] sm:$0xff]  ;;  %v1263_v45 = vld [vmem:[#allocation6 + $0x10] sm:$0xff] }
  0x36   : > { %v1273_v40 = vld [vmem:[#allocation6 + $0x60] sm:$0xff]  ;;  %v1272_v44 = vld [vmem:[#allocation6 + $0x58] sm:$0xff]  ;;  %v1271_v46 = vld [vmem:[#allocation6 + $0x50] sm:$0xff] }
  0x37   : > { %v1336_v52 = vld [vmem:[%s1632_s2] ss:$0 sm:$0xff]  ;;  %v1262_v60 = vld [vmem:[#allocation6 + $0x8] sm:$0xff]  ;;  %v1280_v0 = vld [vmem:[#allocation7 + $0x18] sm:$0xff] }
  0x38   : > { %663 = vmatpush.bf16.msrb.mxu0 %v1125_v1  ;;  %676 = vmatpush.bf16.msrb.mxu1 %v1129_v2  ;;  %v1270_v61 = vld [vmem:[#allocation6 + $0x48] sm:$0xff]  ;;  %v1261_v62 = vld [vmem:[#allocation6] sm:$0xff]  ;;  %v1279_v1 = vld [vmem:[#allocation7 + $0x10] sm:$0xff] }
  0x39   : > { %824 = vmatpush.bf16.msrb.mxu2 %v1267_v35  ;;  %837 = vmatpush.bf16.msrb.mxu3 %v1275_v36  ;;  %v1269_v63 = vld [vmem:[#allocation6 + $0x40] sm:$0xff]  ;;  %v1278_v15 = vld [vmem:[#allocation7 + $0x8] sm:$0xff] }
  0x3a   : > { %v575_v2 = vld [vmem:[%s1634_s4] sm:$0x3] }
  0x3b   : > { %v577_v3 = vperm.slane %v575_v2, 0  ;;  %v578_v4 = vperm.slane %v575_v2, 1  ;;  %v1277_v16 = vld [vmem:[#allocation7] sm:$0xff] }
  0x3c   : > { %664 = vmatpush.bf16.msrb.mxu0 %v1117_v7  ;;  %677 = vmatpush.bf16.msrb.mxu1 %v1121_v8  ;;  %v1337_v17 = vld [vmem:[%s1636_s6] ss:$0 sm:$0xff] }
  0x3d   : > { %825 = vmatpush.bf16.msrb.mxu2 %v1266_v37  ;;  %838 = vmatpush.bf16.msrb.mxu3 %v1274_v38 }
  0x40   : > { %665 = vmatpush.bf16.msrb.mxu0 %v1109_v12  ;;  %678 = vmatpush.bf16.msrb.mxu1 %v1113_v14 }
  0x41   : > { %826 = vmatpush.bf16.msrb.mxu2 %v1265_v39  ;;  %839 = vmatpush.bf16.msrb.mxu3 %v1273_v40 }
  0x44   : > { %666 = vmatpush.bf16.msrb.mxu0 %v1101_v18  ;;  %679 = vmatpush.bf16.msrb.mxu1 %v1105_v20 }
  0x45   : > { %827 = vmatpush.bf16.msrb.mxu2 %v1264_v43  ;;  %840 = vmatpush.bf16.msrb.mxu3 %v1272_v44 }
  0x48   : > { %667 = vmatpush.bf16.msrb.mxu0 %v1093_v24  ;;  %680 = vmatpush.bf16.msrb.mxu1 %v1097_v26  ;;  %v1338_v26 = vld [vmem:[%s1638_s8] ss:$0 sm:$0xff] }
  0x49   : > { %828 = vmatpush.bf16.msrb.mxu2 %v1263_v45  ;;  %841 = vmatpush.bf16.msrb.mxu3 %v1271_v46 }
  0x4c   : > { %668 = vmatpush.bf16.msrb.mxu0 %v1085_v30  ;;  %681 = vmatpush.bf16.msrb.mxu1 %v1089_v32 }
  0x4d   : > { %829 = vmatpush.bf16.msrb.mxu2 %v1262_v60  ;;  %842 = vmatpush.bf16.msrb.mxu3 %v1270_v61 }
  0x50   : > { %894 = vmatpush.bf16.msra.mxu0 %v1280_v0 }
  0x51   : > { %830 = vmatpush.bf16.msrb.mxu2 %v1261_v62  ;;  %843 = vmatpush.bf16.msrb.mxu3 %v1269_v63 }
  0x54   : > { %895 = vmatpush.bf16.msra.mxu0 %v1279_v1 }
  0x58   : > { %896 = vmatpush.bf16.msra.mxu0 %v1278_v15 }
  0x5c   : > { %897 = vmatpush.bf16.msra.mxu0 %v1277_v16 }
  0xac   : > { %v506_v41 = vpop.f32.mrf.mxu0  ;;  %v519_v42 = vpop.f32.mrf.mxu1 }
  0xad   : > { %v549_v47 = vmax.f32 %v506_v41, %v519_v42 }
  0xb4   : > { %v532_v48 = vpop.f32.mrf.mxu2  ;;  %v545_v49 = vpop.f32.mrf.mxu3 }
  0xb5   : > { %v508_v50 = vpop.f32.mrf.mxu0  ;;  %v550_v51 = vmax.f32 %v532_v48, %v545_v49  ;;  %v521_v53 = vpop.f32.mrf.mxu1 }
  0xb7   : > { %v551_v54 = vmax.f32 %v549_v47, %v550_v51 }
  0xb9   : > { %v556_v55 = vadd.f32 %v1336_v52, %v551_v54 }
  0xbb   : > { %v557_v57 = vmax.f32 %v556_v55, 0.0 }
  0xbc   : > { %v534_v56 = vpop.f32.mrf.mxu2  ;;  %v547_v58 = vpop.f32.mrf.mxu3 }
  0xbd   : > { %v558_v59 = vpack.c.bf16 %v557_v57, %v557_v57 }
  0xbf   : > { %669 = vmatmul.bf16.vlgmr.msrb.gmra.mxu0 %v558_v59  ;;  %682 = vmatmul.bf16.vlgmr.msrb.gmra.mxu1 %v558_v59 }
 0x13c   : > { %v670_v5 = vpop.f32.mrf.mxu0  ;;  %v683_v6 = vpop.f32.mrf.mxu1 }
 0x13d   : > { %v671_v7 = vadd.f32 %v670_v5, %v577_v3  ;;  %v684_v8 = vadd.f32 %v683_v6, %v578_v4 }
 0x13f   : > { %v687_v9 = vmax.f32 %v671_v7, 0.0  ;;  %v688_v10 = vmax.f32 %v684_v8, 0.0 }
 0x141   : > { %v689_v11 = vpack.c.bf16 %v687_v9, %v687_v9  ;;  %v690_v12 = vpack.c.bf16 %v688_v10, %v688_v10 }
 0x143   : > { %831 = vmatmul.bf16.vlgmr.msrb.gmra.mxu2 %v689_v11  ;;  %844 = vmatmul.bf16.vlgmr.msrb.gmra.mxu3 %v690_v12 }
 0x144   : > { %v672_v13 = vpop.f32.mrf.mxu0  ;;  %v685_v14 = vpop.f32.mrf.mxu1 }
 0x1c6   : > { %v832_v18 = vpop.f32.mrf.mxu2  ;;  %v845_v19 = vpop.f32.mrf.mxu3 }
 0x1c7   : > { %v833_v20 = vadd.f32 %v1337_v17, %v832_v18 }
 0x1c9   : > { %v846_v21 = vadd.f32 %v845_v19, %v833_v20 }
 0x1cb   : > { %v849_v22 = vmax.f32 %v846_v21, 0.0 }
 0x1cd   : > { %v850_v23 = vpack.c.bf16 %v849_v22, %v849_v22 }
 0x1ce   : > { %v834_v24 = vpop.f32.mrf.mxu2  ;;  %v847_v25 = vpop.f32.mrf.mxu3 }
 0x1cf   : > { %1226 = vmatmul.msk.bf16.vlgmr.msra.gmra.mxu0 %vm493_vm0, %v850_v23 }
 0x24c   : > { %v899_v27 = vpop.f32.mrf.mxu0 }
 0x24d   : > { %v900_v28 = vadd.f32 %v1338_v26, %v899_v27 }
 0x24f   : > { %904 = vst.msk [vmem:[%s394_s21] sm:$0xff] %vm903_vm1, %v900_v28 }
 0x254   : > { %v901_v29 = vpop.f32.mrf.mxu0 }
 0x255 PF: > { %s22_s30 = sadd.s32 1, %s1477_s30  }
 0x256   : > { %p19_p7 = scmp.ge.s32.totalorder %s22_s30, 4  }
 0x258   :  { %21 = sbr.rel (!%p19_p7) target bundleno = 3 (0x3), region = 103 }
 0x25d   :  { %924 = vsyncpa [#allocation3], 1 }
 0x25e   :  { %926 = vsyncpa [#allocation3 + $0x1], 1 }
 0x25f   :  { %927 = vsyncpa [#allocation5], 1 }
 0x260   :  { %928 = vsyncpa [#allocation8], 1 }

</bundles_post_ra>
